<compile_context>
chip_gen: v7x
topology: tpu7x:2x2x1
jax: 0.10.0
libtpu: 0.0.40
codegen_flags: <defaults>
</compile_context>

<pallas_src>
import functools
import math

import jax
import jax.numpy as jnp
from jax.experimental import pallas as pl
from jax.experimental.pallas import tpu as pltpu


_NEG_BIG = -1e30      # finite "-inf" sentinel (avoids NaN from inf - inf)
_GATE = -5e29         # rows whose running max never exceeds this had no in-edges


# --------------------------------------------------------------------------
# Kernel A: head-batched projection + fused attention terms (runs once per N).
# --------------------------------------------------------------------------
def _proj_kernel(h_ref, w_ref, alr_ref, feat_ref, elr_ref):
    """h_ref:(TM,F_in) bf16, w_ref:(F_in,H*F) bf16, alr_ref:(H*F,2H) bf16.

    feat_ref:(TM,H*F) bf16 projected features (all heads, one MXU pass)
    elr_ref :(TM,2H)  f32  [el | er] attention terms (one fused MXU pass)
    """
    feat = jnp.dot(h_ref[...], w_ref[...], preferred_element_type=jnp.float32)
    feat_bf = feat.astype(jnp.bfloat16)
    feat_ref[...] = feat_bf
    elr_ref[...] = jnp.dot(feat_bf, alr_ref[...], preferred_element_type=jnp.float32)


def gat_project(h_bf16, w_all, alr_mat, *, num_heads, f_out, row_tile,
                vmem_limit_bytes=None):
    n_pad, f_in = h_bf16.shape
    hf = num_heads * f_out
    return pl.pallas_call(
        _proj_kernel,
        out_shape=(jax.ShapeDtypeStruct((n_pad, hf), jnp.bfloat16),
                   jax.ShapeDtypeStruct((n_pad, 2 * num_heads), jnp.float32)),
        grid=(n_pad // row_tile,),
        in_specs=[
            pl.BlockSpec((row_tile, f_in), lambda i: (i, 0)),
            pl.BlockSpec((f_in, hf), lambda i: (0, 0)),
            pl.BlockSpec((hf, 2 * num_heads), lambda i: (0, 0)),
        ],
        out_specs=(pl.BlockSpec((row_tile, hf), lambda i: (i, 0)),
                   pl.BlockSpec((row_tile, 2 * num_heads), lambda i: (i, 0))),
        compiler_params=pltpu.CompilerParams(
            dimension_semantics=("parallel",),
            vmem_limit_bytes=vmem_limit_bytes),
    )(h_bf16, w_all, alr_mat)


# --------------------------------------------------------------------------
# Kernel B: flash-style masked softmax + aggregation over src-column chunks.
# --------------------------------------------------------------------------
def _attn_agg_kernel(adj_ref, er_ref, elt_ref, feat_ref, out_ref,
                     m_sc, l_sc, acc_sc, *,
                     num_heads, f_out, negative_slope, apply_elu, mean_heads):
    """One (dst-row tile, src-col chunk) step of the online softmax.

    adj_ref : (TM, TC)   int8, adj[dst, src] != 0 iff edge src->dst
    er_ref  : (TM, H)    f32 destination attention terms
    elt_ref : (H, TC)    f32 source attention terms (pre-transposed)
    feat_ref: (TC, H*F)  bf16 projected source features
    out_ref : (TM, H*F) hidden layers  /  (TM, F) final layer (head mean)
    m_sc/l_sc: (H, TM, 1) f32 running max / denominator
    acc_sc  : (H, TM, F)  f32 running weighted feature sum
    """
    k = pl.program_id(1)

    @pl.when(k == 0)
    def _():
        m_sc[...] = jnp.full_like(m_sc, _NEG_BIG)
        l_sc[...] = jnp.zeros_like(l_sc)
        acc_sc[...] = jnp.zeros_like(acc_sc)

    mask = adj_ref[...] != 0                     # (TM, TC), shared by all heads
    er = er_ref[...]                             # (TM, H)
    elt = elt_ref[...]                           # (H, TC)
    feat = feat_ref[...]                         # (TC, H*F) bf16

    for h in range(num_heads):
        s = er[:, h:h + 1] + elt[h:h + 1, :]             # (TM, TC)
        s = jnp.maximum(s, negative_slope * s)           # LeakyReLU (slope < 1)
        s = jnp.where(mask, s, _NEG_BIG)                 # mask non-edges
        m_prev = m_sc[h]                                 # (TM, 1)
        m_new = jnp.maximum(m_prev, jnp.max(s, axis=-1, keepdims=True))
        a = jnp.exp(m_prev - m_new)                      # rescale previous chunks
        p = jnp.exp(s - m_new)                           # masked entries -> 0 (once
                                                         # any real edge is seen)
        l_sc[h] = a * l_sc[h] + jnp.sum(p, axis=-1, keepdims=True)
        acc_sc[h] = a * acc_sc[h] + jnp.dot(
            p.astype(jnp.bfloat16), feat[:, h * f_out:(h + 1) * f_out],
            preferred_element_type=jnp.float32)
        m_sc[h] = m_new

    @pl.when(k == pl.num_programs(1) - 1)
    def _():
        if mean_heads:
            acc = None
            for h in range(num_heads):
                inv_l = pl.reciprocal(jnp.maximum(l_sc[h], 1e-20), approx=True)
                rst = acc_sc[h] * inv_l
                # Nodes with no in-edges (incl. padded rows) -> zero output.
                rst = jnp.where(m_sc[h] > _GATE, rst, 0.0)
                acc = rst if acc is None else acc + rst
            out_ref[...] = (acc * (1.0 / num_heads)).astype(out_ref.dtype)   # .mean(1)
        else:
            for h in range(num_heads):
                inv_l = pl.reciprocal(jnp.maximum(l_sc[h], 1e-20), approx=True)
                rst = acc_sc[h] * inv_l
                rst = jnp.where(m_sc[h] > _GATE, rst, 0.0)
                if apply_elu:                                                # fused ELU
                    rst = jnp.where(rst > 0, rst, jnp.exp(jnp.minimum(rst, 0.0)) - 1.0)
                # fused .flatten(1): write this head's slice directly (no concat)
                out_ref[:, h * f_out:(h + 1) * f_out] = rst.astype(out_ref.dtype)


def gat_attend(adj_i8, er, el_t, feat, *, num_heads, f_out, negative_slope,
               apply_elu, mean_heads, row_tile, col_tile, out_dtype,
               vmem_limit_bytes=None):
    n_pad = adj_i8.shape[0]
    hf = num_heads * f_out
    out_width = f_out if mean_heads else hf
    kernel = functools.partial(
        _attn_agg_kernel, num_heads=num_heads, f_out=f_out,
        negative_slope=negative_slope, apply_elu=apply_elu, mean_heads=mean_heads)
    return pl.pallas_call(
        kernel,
        out_shape=jax.ShapeDtypeStruct((n_pad, out_width), out_dtype),
        grid=(n_pad // row_tile, n_pad // col_tile),
        in_specs=[
            pl.BlockSpec((row_tile, col_tile), lambda i, k: (i, k)),      # adjacency
            pl.BlockSpec((row_tile, num_heads), lambda i, k: (i, 0)),     # er (dst)
            pl.BlockSpec((num_heads, col_tile), lambda i, k: (0, k)),     # el^T (src)
            pl.BlockSpec((col_tile, hf), lambda i, k: (k, 0)),            # feat (src)
        ],
        out_specs=pl.BlockSpec((row_tile, out_width), lambda i, k: (i, 0)),
        scratch_shapes=[
            pltpu.VMEM((num_heads, row_tile, 1), jnp.float32),     # running max m
            pltpu.VMEM((num_heads, row_tile, 1), jnp.float32),     # running denom l
            pltpu.VMEM((num_heads, row_tile, f_out), jnp.float32), # running acc
        ],
        compiler_params=pltpu.CompilerParams(
            dimension_semantics=("parallel", "arbitrary"),
            vmem_limit_bytes=vmem_limit_bytes),
    )(adj_i8, er, el_t, feat)


# --------------------------------------------------------------------------
# Layer wrapper / parameter packing / full forward.
# --------------------------------------------------------------------------
def gat_layer(h_bf16, adj_i8, w_all, alr_mat, *, num_heads, f_out,
              negative_slope=0.2, apply_elu=False, mean_heads=False,
              row_tile=128, col_tile=128, vmem_limit_bytes=None):
    """One KAGATConv layer (all heads). h_bf16:(Npad,F_in), adj_i8:(Npad,Npad)."""
    feat, elr = gat_project(h_bf16, w_all, alr_mat, num_heads=num_heads,
                            f_out=f_out, row_tile=row_tile,
                            vmem_limit_bytes=vmem_limit_bytes)
    # Tiny wrapper-side layout plumbing: pre-transpose el so the kernel's per-head
    # loop only takes static row slices (no in-loop XLU transposes).
    el_t = jnp.transpose(elr[:, :num_heads])            # (H, Npad)
    er = elr[:, num_heads:]                              # (Npad, H)
    out_dtype = jnp.float32 if mean_heads else jnp.bfloat16
    return gat_attend(adj_i8, er, el_t, feat, num_heads=num_heads, f_out=f_out,
                      negative_slope=negative_slope, apply_elu=apply_elu,
                      mean_heads=mean_heads, row_tile=row_tile, col_tile=col_tile,
                      out_dtype=out_dtype, vmem_limit_bytes=vmem_limit_bytes)


def pack_layer_params(w, attn_l, attn_r):
    """(H,F_in,F_out)/(H,1,F_out) -> bf16 head-concatenated W and (H*F_out,2H) attn."""
    H, F_in, F_out = w.shape
    w_all = jnp.transpose(w, (1, 0, 2)).reshape(F_in, H * F_out).astype(jnp.bfloat16)
    alr = jnp.zeros((H * F_out, 2 * H), jnp.float32)
    for h in range(H):
        alr = alr.at[h * F_out:(h + 1) * F_out, h].set(attn_l[h, 0, :])
        alr = alr.at[h * F_out:(h + 1) * F_out, H + h].set(attn_r[h, 0, :])
    return w_all, alr.astype(jnp.bfloat16)


def _round_up(x, m):
    return ((x + m - 1) // m) * m


def gat_forward(inputs, adj, params, negative_slope=0.2,
                row_tile=128, col_tile=128, vmem_limit_bytes=None):
    """Full GAT forward: hidden layers (flatten heads + ELU, fused) then head-mean.

    inputs:(N,F_in) f32, adj:(N,N) with adj[dst,src] != 0 iff edge src->dst.
    row_tile/col_tile: destination-row / source-column tiles of the attention
    kernel (keep multiples of 32 / 128 for the int8 adjacency; shrink row_tile on
    v7x's 64 MiB VMEM, grow / buffer deeper on v6e).
    """
    N, f_in = inputs.shape
    tile = math.lcm(row_tile, col_tile)
    n_pad = max(tile, _round_up(N, tile))

    # int8 0/1 mask minimizes the dominant O(N^2) HBM/VMEM traffic; padded
    # rows/cols stay zero (masked out, outputs gated to zero).
    adj_i8 = jnp.zeros((n_pad, n_pad), jnp.int8).at[:N, :N].set(
        (adj > 0).astype(jnp.int8))
    h = jnp.zeros((n_pad, f_in), jnp.bfloat16).at[:N, :].set(
        inputs.astype(jnp.bfloat16))

    n_layers = len(params)
    for l, (w, al, ar) in enumerate(params):
        H, _, F_out = w.shape
        w_all, alr = pack_layer_params(w, al, ar)
        is_last = (l == n_layers - 1)
        h = gat_layer(h, adj_i8, w_all, alr, num_heads=H, f_out=F_out,
                      negative_slope=negative_slope, apply_elu=not is_last,
                      mean_heads=is_last, row_tile=row_tile, col_tile=col_tile,
                      vmem_limit_bytes=vmem_limit_bytes)
    return h[:N]


def make_params(key, in_dim, num_hidden, num_classes, heads, num_layers):
    """Deterministic Xavier-ish init of all KAGATConv layer parameters."""
    dims_in = [in_dim] + [num_hidden * heads[l - 1] for l in range(1, num_layers)]
    dims_in.append(num_hidden * heads[-2])
    dims_out = [num_hidden] * num_layers + [num_classes]
    params = []
    for l in range(num_layers + 1):
        key, k1, k2, k3 = jax.random.split(key, 4)
        fi, fo, hh = dims_in[l], dims_out[l], heads[l]
        scale = 1.0 / jnp.sqrt(jnp.float32(fi))
        w = jax.random.normal(k1, (hh, fi, fo), jnp.float32) * scale
        al = jax.random.normal(k2, (hh, 1, fo), jnp.float32) * 0.1
        ar = jax.random.normal(k3, (hh, 1, fo), jnp.float32) * 0.1
        params.append((w, al, ar))
    return params


if __name__ == "__main__":
    # Small synthetic graph / model config.  N is deliberately not a tile
    # multiple to exercise the padding path; tiles of 128 give a (2, 2) grid so
    # the online softmax streams two src-column chunks and the row axis can be
    # megacore-sharded.
    N = 200
    in_dim = 64
    num_hidden = 32          # H*F_out = 128 -> lane-dense hidden-layer outputs
    num_classes = 8
    num_layers = 2
    heads = [4, 4, 2]        # len = num_layers + 1
    negative_slope = 0.2

    key = jax.random.PRNGKey(0)
    kx, ka, kp = jax.random.split(key, 3)

    # Node features.
    x = jax.random.normal(kx, (N, in_dim), jnp.float32)

    # Random sparse-ish adjacency with self-loops, adj[dst, src].
    adj = (jax.random.uniform(ka, (N, N)) < 0.25).astype(jnp.float32)
    adj = jnp.maximum(adj, jnp.eye(N, dtype=jnp.float32))

    params = make_params(kp, in_dim, num_hidden, num_classes, heads, num_layers)

    logits = gat_forward(x, adj, params, negative_slope)
    logits = jax.block_until_ready(logits)
    assert logits.shape == (N, num_classes)
    assert bool(jnp.all(jnp.isfinite(logits)))
    print("KERNEL_OK")
</pallas_src>

<mosaic_0001>
module attributes {stable_mosaic.version = 11 : i64} {
  func.func @_proj_kernel(%arg0: i32, %arg1: memref<128x64xbf16, #tpu.memory_space<vmem>>, %arg2: memref<64x128xbf16, #tpu.memory_space<vmem>>, %arg3: memref<128x8xbf16, #tpu.memory_space<vmem>>, %arg4: memref<128x128xbf16, #tpu.memory_space<vmem>>, %arg5: memref<128x8xf32, #tpu.memory_space<vmem>>) attributes {dimension_semantics = [#tpu.dimension_semantics<parallel>], iteration_bounds = array<i64: 2>, scalar_prefetch = 0 : i64, scratch_operands = 0 : i64, tpu.core_type = #tpu.core_type<tc>, window_params = [{transform_indices = @transform_0, window_bounds = array<i64: 128, 64>}, {pipeline_mode = #tpu.pipeline_mode<synchronous>, transform_indices = @transform_1, window_bounds = array<i64: 64, 128>}, {pipeline_mode = #tpu.pipeline_mode<synchronous>, transform_indices = @transform_2, window_bounds = array<i64: 128, 8>}, {transform_indices = @transform_3, window_bounds = array<i64: 128, 128>}, {transform_indices = @transform_4, window_bounds = array<i64: 128, 8>}]} {
    %c0 = arith.constant 0 : index
    %c0_0 = arith.constant 0 : index
    %0 = vector.load %arg1[%c0, %c0_0] : memref<128x64xbf16, #tpu.memory_space<vmem>>, vector<128x64xbf16>
    %c0_1 = arith.constant 0 : index
    %c0_2 = arith.constant 0 : index
    %1 = vector.load %arg2[%c0_1, %c0_2] : memref<64x128xbf16, #tpu.memory_space<vmem>>, vector<64x128xbf16>
    %cst = arith.constant dense<0.000000e+00> : vector<128x128xf32>
    %2 = tpu.matmul %0, %1, %cst {dimension_numbers = #tpu.dot_dimension_numbers<[1], [0], [0], [1], [0, 0, 1, 1], [], []>} : vector<128x64xbf16>, vector<64x128xbf16>, vector<128x128xf32> -> vector<128x128xf32>
    %3 = arith.truncf %2 : vector<128x128xf32> to vector<128x128xbf16>
    %c0_3 = arith.constant 0 : index
    %c0_4 = arith.constant 0 : index
    %4 = vector.load %arg4[%c0_3, %c0_4] : memref<128x128xbf16, #tpu.memory_space<vmem>>, vector<128x128xbf16>
    tpu.vector_store %arg4[%c0_3, %c0_4], %3 {strides = array<i32>} : memref<128x128xbf16, #tpu.memory_space<vmem>>, vector<128x128xbf16>,
    %c0_5 = arith.constant 0 : index
    %c0_6 = arith.constant 0 : index
    %5 = vector.load %arg3[%c0_5, %c0_6] : memref<128x8xbf16, #tpu.memory_space<vmem>>, vector<128x8xbf16>
    %cst_7 = arith.constant dense<0.000000e+00> : vector<128x8xf32>
    %6 = tpu.matmul %3, %5, %cst_7 {dimension_numbers = #tpu.dot_dimension_numbers<[1], [0], [0], [1], [0, 0, 1, 1], [], []>} : vector<128x128xbf16>, vector<128x8xbf16>, vector<128x8xf32> -> vector<128x8xf32>
    %c0_8 = arith.constant 0 : index
    %c0_9 = arith.constant 0 : index
    %7 = vector.load %arg5[%c0_8, %c0_9] : memref<128x8xf32, #tpu.memory_space<vmem>>, vector<128x8xf32>
    tpu.vector_store %arg5[%c0_8, %c0_9], %6 {strides = array<i32>} : memref<128x8xf32, #tpu.memory_space<vmem>>, vector<128x8xf32>,
    return
  }
  func.func @transform_0(%arg0: i32) -> (i32, i32) {
    %c0_i32 = arith.constant 0 : i32
    %c0_i32_0 = arith.constant 0 : i32
    return %arg0, %c0_i32 : i32, i32
  }
  func.func @transform_1(%arg0: i32) -> (i32, i32) {
    %c0_i32 = arith.constant 0 : i32
    %c0_i32_0 = arith.constant 0 : i32
    %c0_i32_1 = arith.constant 0 : i32
    return %c0_i32, %c0_i32_0 : i32, i32
  }
  func.func @transform_2(%arg0: i32) -> (i32, i32) {
    %c0_i32 = arith.constant 0 : i32
    %c0_i32_0 = arith.constant 0 : i32
    %c0_i32_1 = arith.constant 0 : i32
    return %c0_i32, %c0_i32_0 : i32, i32
  }
  func.func @transform_3(%arg0: i32) -> (i32, i32) {
    %c0_i32 = arith.constant 0 : i32
    %c0_i32_0 = arith.constant 0 : i32
    return %arg0, %c0_i32 : i32, i32
  }
  func.func @transform_4(%arg0: i32) -> (i32, i32) {
    %c0_i32 = arith.constant 0 : i32
    %c0_i32_0 = arith.constant 0 : i32
    return %arg0, %c0_i32 : i32, i32
  }
}

</mosaic_0001>

<bundles_post_ra>
// kernel: tpu_custom_call.1
= control target key start
LH: loop header
LB: loop body
LE: loop exit
PB: predicated region body
PF: predicated region fallthrough
CT: control target
= control target key end

     0   :  { %10 = vsyncpa [#allocation3], 0  ;;  %s1379_s0 = inlined_call_operand.vmem [shape: bf16[256,64], index: 0, kind: input, shape index: {}]   ;;  %s1380_s1 = inlined_call_operand.vmem [shape: bf16[64,128], index: 1, kind: input, shape index: {}]   ;;  %s1381_s2 = inlined_call_operand.vmem [shape: bf16[128,8], index: 2, kind: input, shape index: {}]   ;;  %s1382_s3 = inlined_call_operand.hbm [shape: bf16[256,128], index: 3, kind: output, shape index: {0}]   ;;  %s1383_s4 = inlined_call_operand.vmem [shape: f32[256,8], index: 4, kind: output, shape index: {1}]  }
   0x1   :  { %12 = vsyncpa [#allocation3 + $0x1], 0  ;;  %s1167_s15 = smov 0   ;;  %s1169_s16 = smov 0  }
   0x2   :  { %s1171_s17 = smov 0   ;;  %s1173_s18 = smov 0  }
   0x3 LB: > { %s1188_s19 = sadd.s32 4294967295, %s1137_s18   ;;  %s792_s20 = sadd.s32 4294967294, %s1137_s18   ;;  %s1137_s18 = sphi %s1173_s18, %s1389_s18   ;;  %s1133_s17 = sphi %s1171_s17, %s1388_s17   ;;  %s1129_s16 = sphi %s1169_s16, %s1387_s16   ;;  %s1125_s15 = sphi %s1167_s15, %s1386_s15  }
   0x4   : > { %s1192_s21 = sadd.s32 1, %s1137_s18   ;;  %s93_s22 = sadd.s32 1, %s1133_s17 }
   0x5   : > { %s90_s23 = ssub.s32 %s1137_s18, %s1192_s21  ;;  %p103_p0 = scmp.ne.s32.totalorder %s1133_s17, %s1129_s16 }
   0x6   : > { %p91_p1 = scmp.eq.s32.totalorder %s90_s23, 0  ;;  %p104_p2 = scmp.eq.s32.totalorder %s1188_s19, 1 }
   0x7   : > { %p109_p3 = scmp.ne.s32.totalorder %s1129_s16, %s1125_s15  ;;  %p110_p4 = scmp.eq.s32.totalorder %s792_s20, 1 }
   0x8   : > { %s1203_s24 = scalar_select %p91_p1, %s1133_s17, %s93_s22  }
   0x9   : > { %p1205_p5 = por %p104_p2, %p103_p0  ;;  %p1209_p6 = por %p110_p4, %p109_p3 }
   0xa   : > { %p795_p7 = scmp.ge.s32.totalorder %s1137_s18, 1  ;;  %p169_p8 = scmp.lt.s32.totalorder %s1137_s18, 3 }
   0xc   : > { %p170_p9 = pnand %p795_p7, %p169_p8 }
   0xd   : > { %v1055_v0 = vld [vmem:[%s1380_s1] sm:$0xff] (!%p170_p9)   ;;  %s797_s29 = sshll.u32 (!%p170_p9), %s1188_s19, 4  ;;  %v1056_v1 = vld [vmem:[%s1380_s1 + $0x8] sm:$0xff] (!%p170_p9)   ;;  %v1057_v2 = vld [vmem:[%s1380_s1 + $0x10] sm:$0xff] (!%p170_p9)   ;;  %vm302_vm0 = vcmask (!%p170_p9), 523264   ;;  %s190_s20 = sand.u32 (!%p170_p9), 1, %s1129_s16  }
   0xe   : > { %173 = sbr.rel (%p170_p9) target bundleno = 488 (0x1e8), region = 32  ;;  %p201_p10 = scmp.lt.s32.totalorder (!%p170_p9), %s797_s29, 31  ;;  %942 = vmatprep.subr.bf16.mxu0 (!%p170_p9), %v1055_v0  ;;  %v1067_v3 = vld [vmem:[%s1381_s2] sm:$0xff] (!%p170_p9)   ;;  %v1068_v4 = vld [vmem:[%s1381_s2 + $0x8] sm:$0xff] (!%p170_p9)   ;;  %v1058_v6 = vld [vmem:[%s1380_s1 + $0x18] sm:$0xff] (!%p170_p9)  }
   0xf   : > { %943 = vmatpush3.bf16.msra.mxu0 (!%p170_p9), %v1055_v0  ;;  %998 = vmatprep.subr.bf16.mxu1 (!%p170_p9), %v1067_v3  ;;  %v1069_v7 = vld [vmem:[%s1381_s2 + $0x10] sm:$0xff] (!%p170_p9)   ;;  %v1070_v10 = vld [vmem:[%s1381_s2 + $0x18] sm:$0xff] (!%p170_p9)   ;;  %v1071_v11 = vld [vmem:[%s1381_s2 + $0x20] sm:$0xff] (!%p170_p9)   ;;  %s796_s22 = sshll.u32 (!%p170_p9), %s190_s20, 6  ;;  %s866_s23 = sshll.u32 (!%p170_p9), %s1188_s19, 10 }
  0x10   : > { %944 = vmatprep.subr.bf16.mxu0 (!%p170_p9), %v1056_v1  ;;  %1006 = vmatpush3.bf16.msra.mxu1 (!%p170_p9), %v1067_v3  ;;  %v1072_v14 = vld [vmem:[%s1381_s2 + $0x28] sm:$0xff] (!%p170_p9)   ;;  %v1073_v15 = vld [vmem:[%s1381_s2 + $0x30] sm:$0xff] (!%p170_p9)   ;;  %v1074_v19 = vld [vmem:[%s1381_s2 + $0x38] sm:$0xff] (!%p170_p9)   ;;  %s1294_s5 = scalar_lea.hbm (!%p170_p9), %s1382_s3, %s866_s23  ;;  %s1300_s6 = scalar_lea.sflag (!%p170_p9), [#allocation3], %s190_s20 }
  0x11   : > { %999 = vmatprep.subr.bf16.mxu1 (!%p170_p9), %v1068_v4  ;;  %s1139_s19 = smov (!%p170_p9), [#allocation2]  }
  0x12   : > { %s1079_s8 = sshll.u32 (!%p170_p9), %s1139_s19, 4  ;;  %s1080_s8 = int_to_ptr.vmem [resolvable:$false] %s1079_s8 }
  0x13   : > { %945 = vmatpush3.bf16.msra.mxu0 (!%p170_p9), %v1056_v1  ;;  %s1081_s9 = scalar_lea.vmem (!%p170_p9), %s1080_s8, 2048 }
  0x14   : > { %946 = vmatprep.subr.bf16.mxu0 (!%p170_p9), %v1057_v2  ;;  %1007 = vmatpush3.bf16.msra.mxu1 (!%p170_p9), %v1068_v4 }
  0x15   : > { %s1391_s29 = smov (!%p201_p10, %s797_s29), 31  ;;  %1000 = vmatprep.subr.bf16.mxu1 %v1069_v7 }
  0x16   : > { %s798_s10 = sshll.u32 %s1391_s29, 2 }
  0x17   : > { %s1234_s13 = scalar_lea.vmem %s1379_s0, %s798_s10  ;;  %947 = vmatpush3.bf16.msra.mxu0 %v1057_v2 }
  0x18   : > { %v1059_v5 = vld [vmem:[%s1234_s13] sm:$0xff]   ;;  %948 = vmatprep.subr.bf16.mxu0 %v1058_v6  ;;  %v1060_v8 = vld [vmem:[%s1234_s13 + $0x8] sm:$0xff]   ;;  %v1061_v9 = vld [vmem:[%s1234_s13 + $0x10] sm:$0xff]   ;;  %1008 = vmatpush3.bf16.msra.mxu1 %v1069_v7 }
  0x19   : > { %950 = vmatprep.mubr.msk.bf16.mxu0 %vm302_vm0, %v1059_v5  ;;  %1001 = vmatprep.subr.bf16.mxu1 %v1070_v10  ;;  %v1062_v12 = vld [vmem:[%s1234_s13 + $0x18] sm:$0xff]   ;;  %v1063_v13 = vld [vmem:[%s1234_s13 + $0x20] sm:$0xff]   ;;  %v1064_v16 = vld [vmem:[%s1234_s13 + $0x28] sm:$0xff]  }
  0x1a   : > { %v1065_v17 = vld [vmem:[%s1234_s13 + $0x30] sm:$0xff]   ;;  %v1066_v18 = vld [vmem:[%s1234_s13 + $0x38] sm:$0xff]   ;;  %s1279_s13 = scalar_lea.vmem [#allocation2], %s796_s22 }
  0x1b   : > { %949 = vmatpush3.bf16.msra.mxu0 %v1058_v6  ;;  %s701_s27 = sshll.u32 %s1279_s13, 4  ;;  %s1296_s27 = int_to_ptr.vmem [resolvable:$true] %s701_s27 }
  0x1c   : > { %966 = vmatprep.subr.bf16.mxu0 %v1067_v3  ;;  %1009 = vmatpush3.bf16.msra.mxu1 %v1070_v10  ;;  %s1075_s7 = scalar_lea.vmem %s1296_s27, 1024  ;;  %p1082_p0 = scmp.lt.s32.totalorder %s1296_s27, %s1080_s8 }
  0x1d   : > { %1002 = vmatprep.subr.bf16.mxu1 %v1071_v11  ;;  %p1076_p11 = scmp.ne.s32.totalorder %s1296_s27, %s1075_s7  ;;  %p1083_p1 = scmp.lt.s32.totalorder %s1081_s9, %s1075_s7 }
  0x1e   : > { %951 = vmatmul.mubr.msk.bf16.vlgmr.msra.gmra.mrb[0].mxu0 %vm302_vm0, %v1060_v8 }
  0x1f   : > { %954 = vmatprep.mubr.msk.bf16.mxu0 %vm302_vm0, %v1061_v9  ;;  %967 = vmatpush3.bf16.msra.mxu0 %v1067_v3  ;;  %p1077_p12 = pnand %p1076_p11, %p1205_p5  ;;  %p1084_p2 = por %p1083_p1, %p1082_p0 }
  0x20   : > { %968 = vmatprep.subr.bf16.mxu0 %v1068_v4  ;;  %1010 = vmatpush3.bf16.msra.mxu1 %v1071_v11 }
  0x21   : > { %1003 = vmatprep.subr.bf16.mxu1 %v1072_v14  ;;  %p1078_p13 = pneg %p1077_p12 }
  0x23   : > { %969 = vmatpush3.bf16.msra.mxu0 %v1068_v4  ;;  %p1085_p3 = pnand %p1084_p2, %p1078_p13 }
  0x24   : > { %970 = vmatprep.subr.bf16.mxu0 %v1069_v7  ;;  %1011 = vmatpush3.bf16.msra.mxu1 %v1072_v14 }
  0x25   : > { %1004 = vmatprep.subr.bf16.mxu1 %v1073_v15 }
  0x26   : > { %955 = vmatmul.mubr.msk.bf16.gmra.mrb[4].mxu0 %vm302_vm0, %v1062_v12 }
  0x27   : > { %958 = vmatprep.mubr.msk.bf16.mxu0 %vm302_vm0, %v1063_v13  ;;  %971 = vmatpush3.bf16.msra.mxu0 %v1069_v7 }
  0x28   : > { %972 = vmatprep.subr.bf16.mxu0 %v1070_v10  ;;  %1012 = vmatpush3.bf16.msra.mxu1 %v1073_v15 }
  0x29   : > { %1005 = vmatprep.subr.bf16.mxu1 %v1074_v19 }
  0x2b   : > { %973 = vmatpush3.bf16.msra.mxu0 %v1070_v10 }
  0x2c   : > { %974 = vmatprep.subr.bf16.mxu0 %v1071_v11  ;;  %1013 = vmatpush3.bf16.msra.mxu1 %v1074_v19 }
  0x2e   : > { %959 = vmatmul.mubr.msk.bf16.gmra.mrb[8].mxu0 %vm302_vm0, %v1064_v16 }
  0x2f   : > { %962 = vmatprep.mubr.msk.bf16.mxu0 %vm302_vm0, %v1065_v17  ;;  %975 = vmatpush3.bf16.msra.mxu0 %v1071_v11 }
  0x30   : > { %976 = vmatprep.subr.bf16.mxu0 %v1072_v14 }
  0x33   : > { %977 = vmatpush3.bf16.msra.mxu0 %v1072_v14 }
  0x34   : > { %978 = vmatprep.subr.bf16.mxu0 %v1073_v15 }
  0x36   : > { %963 = vmatmul.mubr.msk.bf16.gmra.mrb[12].mxu0 %vm302_vm0, %v1066_v18 }
  0x37   : > { %979 = vmatpush3.bf16.msra.mxu0 %v1073_v15 }
  0x38   : > { %980 = vmatprep.subr.bf16.mxu0 %v1074_v19 }
  0x3b   : > { %981 = vmatpush3.bf16.msra.mxu0 %v1074_v19 }
  0xf1   : > { %v952_v20 = vpop.f32.mrb[0].mxu0 }
  0xf2   : > { %v361_v21 = vpop.f32.mrb[1].mxu0 }
  0xf3   : > { %v953_v22 = vpop.f32.mrb[2].mxu0 }
  0xf4   : > { %v425_v23 = vpack.c.bf16 %v953_v22, %v952_v20  ;;  %v364_v24 = vpop.f32.mrb[3].mxu0 }
  0xf5   : > { %v424_v25 = vpack.c.bf16 %v364_v24, %v361_v21 }
  0xf6   : > { %907 = vst [vmem:[%s1279_s13 + $0x8] sm:$0xff] %v425_v23  }
  0xf7   : > { %871 = vst [vmem:[%s1279_s13] sm:$0xff] %v424_v25   ;;  %982 = vmatprep.mubr.bf16.mxu0 %v424_v25 }
  0xf8   : > { %983 = vmatmul.mubr.bf16.vlgmr.msra.gmra.mrb[16].mxu0 %v425_v23 }
  0xf9   : > { %v956_v26 = vpop.f32.mrb[4].mxu0 }
  0xfa   : > { %v377_v27 = vpop.f32.mrb[5].mxu0 }
  0xfb   : > { %v957_v28 = vpop.f32.mrb[6].mxu0 }
  0xfc   : > { %v427_v29 = vpack.c.bf16 %v957_v28, %v956_v26  ;;  %v380_v30 = vpop.f32.mrb[7].mxu0 }
  0xfd   : > { %v426_v31 = vpack.c.bf16 %v380_v30, %v377_v27 }
  0xfe   : > { %909 = vst [vmem:[%s1279_s13 + $0x18] sm:$0xff] %v427_v29  }
  0xff   : > { %908 = vst [vmem:[%s1279_s13 + $0x10] sm:$0xff] %v426_v31   ;;  %986 = vmatprep.mubr.bf16.mxu1 %v426_v31 }
 0x100   : > { %987 = vmatmul.mubr.bf16.vlgmr.msra.gmra.mrb[0].mxu1 %v427_v29 }
 0x101   : > { %v960_v32 = vpop.f32.mrb[8].mxu0 }
 0x102   : > { %v393_v33 = vpop.f32.mrb[9].mxu0 }
 0x103   : > { %v961_v34 = vpop.f32.mrb[10].mxu0 }
 0x104   : > { %v429_v35 = vpack.c.bf16 %v961_v34, %v960_v32  ;;  %v396_v36 = vpop.f32.mrb[11].mxu0 }
 0x105   : > { %v428_v37 = vpack.c.bf16 %v396_v36, %v393_v33 }
 0x106   : > { %911 = vst [vmem:[%s1279_s13 + $0x28] sm:$0xff] %v429_v35  }
 0x107   : > { %910 = vst [vmem:[%s1279_s13 + $0x20] sm:$0xff] %v428_v37   ;;  %990 = vmatprep.mubr.bf16.mxu1 %v428_v37 }
 0x108   : > { %991 = vmatmul.mubr.bf16.gmra.mrb[4].mxu1 %v429_v35 }
 0x109   : > { %v964_v38 = vpop.f32.mrb[12].mxu0 }
 0x10a   : > { %v409_v39 = vpop.f32.mrb[13].mxu0 }
 0x10b   : > { %v965_v40 = vpop.f32.mrb[14].mxu0 }
 0x10c   : > { %v431_v41 = vpack.c.bf16 %v965_v40, %v964_v38  ;;  %v412_v42 = vpop.f32.mrb[15].mxu0 }
 0x10d   : > { %v430_v43 = vpack.c.bf16 %v412_v42, %v409_v39 }
 0x10e   : > { %913 = vst [vmem:[%s1279_s13 + $0x38] sm:$0xff] %v431_v41  }
 0x10f   : > { %912 = vst [vmem:[%s1279_s13 + $0x30] sm:$0xff] %v430_v43   ;;  %994 = vmatprep.mubr.bf16.mxu1 %v430_v43 }
 0x110   : > { %995 = vmatmul.mubr.bf16.gmra.mrb[8].mxu1 %v431_v41 }
 0x111   : > { %1088 = shalt.err (!%p1085_p3)
}
 0x112   : > { %s1089_s10 = scalar_lea.hbm %s1294_s5, 1024  ;;  %s1093_s14 = scalar_lea.hbm %s1382_s3, 2048 }
 0x113   : > { %p1090_p4 = scmp.ne.s32.totalorder %s1294_s5, %s1089_s10  ;;  %p1094_p9 = scmp.lt.u32.totalorder %s1294_s5, %s1382_s3 }
 0x114   : > { %p1095_p10 = scmp.lt.u32.totalorder %s1093_s14, %s1089_s10  ;;  %p1097_p12 = scmp.lt.u32.totalorder %s1089_s10, %s1294_s5 }
 0x115   : > { %p1091_p7 = pnand %p1090_p4, %p1205_p5 }
 0x116   : > { %p1096_p11 = por %p1095_p10, %p1094_p9 }
 0x117   : > { %p1092_p8 = pneg %p1091_p7 }
 0x118   : > { %p1098_p13 = por %p1097_p12, %p1096_p11 }
 0x11a   : > { %p1099_p0 = pnand %p1098_p13, %p1092_p8 }
 0x11c   : > { %1102 = shalt.err (!%p1099_p0)
}
 0x11d   : > { %s1140_s13 = smov 64   ;;  %s1141_s23 = smov 4   ;;  %vm665_vm1 = vcmask 64512  }
 0x11e   : > { %1014 = dma.vmem_to_hbm [thread:$0]  (%p1205_p5), %s1296_s27, 1024, %s1294_s5, %s1300_s6, %s1140_s13, %s1140_s13, %s1141_s23  }
 0x11f   : > { %s800_s28 = sshll.u32 %s1391_s29, 3 }
 0x120   : > { %s1328_s19 = scalar_lea.vmem %s1383_s4, %s800_s28 }
 0x1cb   : > { %v984_v44 = vpop.f32.mrb[16].mxu0 }
 0x1cc   : > { %668 = vst.msk [vmem:[%s1328_s19 + $0x10] sm:$0xff] %vm665_vm1, %v984_v44  ;;  %v602_v45 = vpop.f32.mrb[17].mxu0 }
 0x1cd   : > { %666 = vst.msk [vmem:[%s1328_s19] sm:$0xff] %vm665_vm1, %v602_v45  ;;  %v985_v46 = vpop.f32.mrb[18].mxu0 }
 0x1ce   : > { %669 = vst.msk [vmem:[%s1328_s19 + $0x18] sm:$0xff] %vm665_vm1, %v985_v46  ;;  %v605_v47 = vpop.f32.mrb[19].mxu0 }
 0x1cf   : > { %667 = vst.msk [vmem:[%s1328_s19 + $0x8] sm:$0xff] %vm665_vm1, %v605_v47 }
 0x1d3   : > { %v988_v48 = vpop.f32.mrb[0].mxu1 }
 0x1d4   : > { %672 = vst.msk [vmem:[%s1328_s19 + $0x30] sm:$0xff] %vm665_vm1, %v988_v48  ;;  %v618_v49 = vpop.f32.mrb[1].mxu1 }
 0x1d5   : > { %670 = vst.msk [vmem:[%s1328_s19 + $0x20] sm:$0xff] %vm665_vm1, %v618_v49  ;;  %v989_v50 = vpop.f32.mrb[2].mxu1 }
 0x1d6   : > { %673 = vst.msk [vmem:[%s1328_s19 + $0x38] sm:$0xff] %vm665_vm1, %v989_v50  ;;  %v621_v51 = vpop.f32.mrb[3].mxu1 }
 0x1d7   : > { %671 = vst.msk [vmem:[%s1328_s19 + $0x28] sm:$0xff] %vm665_vm1, %v621_v51 }
 0x1db   : > { %v992_v52 = vpop.f32.mrb[4].mxu1 }
 0x1dc   : > { %676 = vst.msk [vmem:[%s1328_s19 + $0x50] sm:$0xff] %vm665_vm1, %v992_v52  ;;  %v634_v53 = vpop.f32.mrb[5].mxu1 }
 0x1dd   : > { %674 = vst.msk [vmem:[%s1328_s19 + $0x40] sm:$0xff] %vm665_vm1, %v634_v53  ;;  %v993_v54 = vpop.f32.mrb[6].mxu1 }
 0x1de   : > { %677 = vst.msk [vmem:[%s1328_s19 + $0x58] sm:$0xff] %vm665_vm1, %v993_v54  ;;  %v637_v55 = vpop.f32.mrb[7].mxu1 }
 0x1df   : > { %675 = vst.msk [vmem:[%s1328_s19 + $0x48] sm:$0xff] %vm665_vm1, %v637_v55 }
 0x1e3   : > { %v996_v56 = vpop.f32.mrb[8].mxu1 }
 0x1e4   : > { %680 = vst.msk [vmem:[%s1328_s19 + $0x70] sm:$0xff] %vm665_vm1, %v996_v56  ;;  %v650_v57 = vpop.f32.mrb[9].mxu1 }
 0x1e5   : > { %678 = vst.msk [vmem:[%s1328_s19 + $0x60] sm:$0xff] %vm665_vm1, %v650_v57  ;;  %v997_v58 = vpop.f32.mrb[10].mxu1 }
 0x1e6   : > { %681 = vst.msk [vmem:[%s1328_s19 + $0x78] sm:$0xff] %vm665_vm1, %v997_v58  ;;  %v653_v59 = vpop.f32.mrb[11].mxu1 }
 0x1e7   : > { %679 = vst.msk [vmem:[%s1328_s19 + $0x68] sm:$0xff] %vm665_vm1, %v653_v59 }
 0x1e8 PF: > { %p1020_p5 = scmp.ge.s32.totalorder %s1137_s18, 2  ;;  %s720_s25 = sand.u32 1, %s1125_s15  }
 0x1e9   : > { %s721_s29 = scalar_lea.sflag [#allocation3], %s720_s25 }
 0x1ea   : > { %p1017_p1 = pnand %p1020_p5, %p1209_p6 }
 0x1ec   : > { %1120 = dma.done.wait (!%p1017_p1), %s721_s29, 1024  }
 0x1ed   : > { %1122 = vsyncadd (!%p1017_p1), %s721_s29, 4294966272  ;;  %p15_p2 = scmp.ge.s32.totalorder %s1192_s21, 4   ;;  %s1386_s15 = smov %s1129_s16 }
 0x1ee   : > { %s1387_s16 = smov %s1133_s17  ;;  %s1388_s17 = smov %s1203_s24 }
 0x1ef   : > { %s1389_s18 = smov %s1192_s21  ;;  %17 = sbr.rel (!%p15_p2) target bundleno = 3 (0x3), region = 79 }
 0x1f6   :  { %734 = vsyncpa [#allocation3], 1 }
 0x1f7   :  { %736 = vsyncpa [#allocation3 + $0x1], 1 }

</bundles_post_ra>
